<compile_context>
chip_gen: v7x
topology: tpu7x:2x2x1
jax: 0.10.0
libtpu: 0.0.40
codegen_flags: <defaults>
</compile_context>

<pallas_src>
import functools

import jax
import jax.numpy as jnp
from jax.experimental import pallas as pl
from jax.experimental.pallas import tpu as pltpu


def _round_up(x, m):
    return (x + m - 1) // m * m


_VMEM_CAP_CACHE = []


def _vmem_capacity_bytes():
    """Physical VMEM per core (trace-time query, cached, with safe fallback)."""
    if not _VMEM_CAP_CACHE:
        try:
            _VMEM_CAP_CACHE.append(int(pltpu.get_tpu_info().vmem_capacity_bytes))
        except Exception:  # pragma: no cover - conservative default (v7x-sized)
            _VMEM_CAP_CACHE.append(64 * 1024 * 1024)
    return _VMEM_CAP_CACHE[0]


def _disc_kernel(x_ref, w1_ref, b1_ref, w2_ref, b2_ref, o_ref):
    # Layer 1 on the MXU: (TB, F) @ (F, H), f32 accumulation.
    h = jnp.dot(x_ref[...], w1_ref[...], preferred_element_type=jnp.float32)
    h = jnp.maximum(h + b1_ref[...], 0.0)                 # bias + ReLU (VPU, f32)
    # Layer 2 (H -> 1): VPU multiply + XLU lane reduce (no N=1 MXU matmul).
    z = jnp.sum(h * w2_ref[...], axis=-1) + b2_ref[0]     # (TB,)
    # Sigmoid with exp and reciprocal both on the EUP slot (free vs. VALU div).
    s = pl.reciprocal(1.0 + jnp.exp(-z), approx=True)
    # Lane-dense store: one (1, TB) row per grid step.
    o_ref[...] = s[None, :].astype(o_ref.dtype)


@functools.partial(jax.jit, static_argnames=("tb",))
def gan_discriminator(x, w1, b1, w2, b2, *, tb=None):
    """x: (B, input_dim) -> (B, 1) float32, matching the torch module.

    x (and w1) may be bf16 to halve HBM traffic; accumulation stays f32.
    tb=None picks the largest batch tile that fits the per-generation VMEM
    budget (lane-padding aware).
    """
    B, F = x.shape
    H = w1.shape[1]

    # --- Generation-dependent VMEM budget -----------------------------------
    vmem_cap = _vmem_capacity_bytes()
    if vmem_cap >= 96 * 1024 * 1024:          # v5e / v6e: 128 MiB physical VMEM
        vmem_limit = 64 * 1024 * 1024
        x_buf_budget = 16 * 1024 * 1024       # per x buffer (double-buffered)
    else:                                     # v7x: 64 MiB physical VMEM
        vmem_limit = 48 * 1024 * 1024
        x_buf_budget = 12 * 1024 * 1024

    # --- Batch tile (lane-padding-aware accounting) --------------------------
    # Physical VMEM bytes per x row: the minor dim is padded to 128 lanes.
    row_bytes = _round_up(F, 128) * x.dtype.itemsize
    tb_cap = max(128, (x_buf_budget // row_bytes) // 128 * 128)
    if tb is None:
        tb = tb_cap                            # biggest tile within the budget
    else:
        tb = max(128, min(int(tb), tb_cap) // 128 * 128)
    # Never tile beyond the (128-padded) batch.
    b128 = _round_up(B, 128)
    tb = min(tb, b128)
    # v7x megacore: keep >= 2 grid steps when the batch allows so
    # dimension_semantics=("parallel",) gives both TensorCores work
    # (no-op on single-TC v5e/v6e).
    if tb >= b128 and B >= 256:
        tb = max(128, (b128 // 2) // 128 * 128)

    Bp = _round_up(B, tb)
    n_blocks = Bp // tb
    if Bp != B:
        # NOTE: this pad copies x once; for large batches keep B % tb == 0
        # upstream so the kernel's HBM traffic is exactly one read of x.
        x = jnp.pad(x, ((0, Bp - B), (0, 0)))

    # Params: weights in the streaming dtype for the MXU; small vectors kept in
    # f32 for the elementwise math (v5e has no bf16 VPU); b2 as an SMEM scalar.
    w1 = w1.astype(x.dtype)
    b1_row = b1.reshape(1, H).astype(jnp.float32)
    w2_row = w2.reshape(1, H).astype(jnp.float32)
    b2_s = b2.reshape(-1).astype(jnp.float32)              # shape (1,)

    out = pl.pallas_call(
        _disc_kernel,
        out_shape=jax.ShapeDtypeStruct((1, Bp), jnp.float32),
        grid_spec=pltpu.PrefetchScalarGridSpec(
            num_scalar_prefetch=0,
            grid=(n_blocks,),
            in_specs=[
                # x streamed per batch tile (F == full array dim, so legal even
                # when F is not a multiple of 128; lane padding is accounted
                # for in the tb budget above instead of padding x in HBM).
                pl.BlockSpec((tb, F), lambda i: (i, 0)),
                # Weights / biases: constant index maps -> DMA'd once.
                pl.BlockSpec((F, H), lambda i: (0, 0)),
                pl.BlockSpec((1, H), lambda i: (0, 0)),
                pl.BlockSpec((1, H), lambda i: (0, 0)),
                pl.BlockSpec(memory_space=pltpu.MemorySpace.SMEM),
            ],
            # Lane-dense output slab: (1, tb) block per grid step.
            out_specs=pl.BlockSpec((1, tb), lambda i: (0, i)),
        ),
        compiler_params=pltpu.CompilerParams(
            dimension_semantics=("parallel",),   # shard batch tiles on v7x
            vmem_limit_bytes=vmem_limit,
        ),
    )(x, w1, b1_row, w2_row, b2_s)

    return out[0, :B].reshape(B, 1)


def init_params(key, input_dim, hidden=32, out=1, dtype=jnp.float32):
    """Deterministic PyTorch-style (kaiming-uniform-ish) init for the two Linears."""
    k1, k2, k3, k4 = jax.random.split(key, 4)
    bound1 = 1.0 / jnp.sqrt(input_dim)
    bound2 = 1.0 / jnp.sqrt(hidden)
    w1 = jax.random.uniform(k1, (input_dim, hidden), dtype, -bound1, bound1)
    b1 = jax.random.uniform(k2, (1, hidden), dtype, -bound1, bound1)
    w2 = jax.random.uniform(k3, (hidden, out), dtype, -bound2, bound2)
    b2 = jax.random.uniform(k4, (1, out), dtype, -bound2, bound2)
    return w1, b1, w2, b2


if __name__ == "__main__":
    key = jax.random.PRNGKey(0)
    k_x, k_p = jax.random.split(key)

    batch, input_dim = 8, 16
    # Stream activations in bf16 (halves HBM bytes); math/accumulation stay f32.
    x = jax.random.normal(k_x, (batch, input_dim), jnp.float32).astype(jnp.bfloat16)
    w1, b1, w2, b2 = init_params(k_p, input_dim)

    out = jax.block_until_ready(gan_discriminator(x, w1, b1, w2, b2))

    # Pure-JAX reference of the same forward pass (same bf16-rounded inputs).
    xf = x.astype(jnp.float32)
    w1f = w1.astype(jnp.bfloat16).astype(jnp.float32)
    hf = jnp.maximum(
        jnp.dot(xf, w1f, precision=jax.lax.Precision.HIGHEST) + b1, 0.0)
    ref = jax.nn.sigmoid(
        jnp.dot(hf, w2, precision=jax.lax.Precision.HIGHEST) + b2)

    assert out.shape == (batch, 1)
    # Slightly looser tolerance: the EUP approximate reciprocal in the sigmoid
    # has ~1e-4-level relative error on values bounded by 1.
    assert jnp.allclose(out, ref, atol=2e-3, rtol=2e-3)

    print("KERNEL_OK")
</pallas_src>

<mosaic_0001>
module attributes {stable_mosaic.version = 11 : i64} {
  func.func @_disc_kernel(%arg0: i32, %arg1: memref<128x16xbf16, #tpu.memory_space<vmem>>, %arg2: memref<16x32xbf16, #tpu.memory_space<vmem>>, %arg3: memref<1x32xf32, #tpu.memory_space<vmem>>, %arg4: memref<1x32xf32, #tpu.memory_space<vmem>>, %arg5: memref<1xf32, #tpu.memory_space<smem>>, %arg6: memref<1x128xf32, #tpu.memory_space<vmem>>) attributes {dimension_semantics = [#tpu.dimension_semantics<parallel>], iteration_bounds = array<i64: 1>, scalar_prefetch = 0 : i64, scratch_operands = 0 : i64, tpu.core_type = #tpu.core_type<tc>, window_params = [{transform_indices = @transform_0, window_bounds = array<i64: 128, 16>}, {pipeline_mode = #tpu.pipeline_mode<synchronous>, transform_indices = @transform_1, window_bounds = array<i64: 16, 32>}, {pipeline_mode = #tpu.pipeline_mode<synchronous>, transform_indices = @transform_2, window_bounds = array<i64: 1, 32>}, {pipeline_mode = #tpu.pipeline_mode<synchronous>, transform_indices = @transform_3, window_bounds = array<i64: 1, 32>}, {transform_indices = @transform_4, window_bounds = array<i64: 1>}, {transform_indices = @transform_5, window_bounds = array<i64: 1, 128>}]} {
    %c0 = arith.constant 0 : index
    %c0_0 = arith.constant 0 : index
    %0 = vector.load %arg1[%c0, %c0_0] : memref<128x16xbf16, #tpu.memory_space<vmem>>, vector<128x16xbf16>
    %c0_1 = arith.constant 0 : index
    %c0_2 = arith.constant 0 : index
    %1 = vector.load %arg2[%c0_1, %c0_2] : memref<16x32xbf16, #tpu.memory_space<vmem>>, vector<16x32xbf16>
    %cst = arith.constant dense<0.000000e+00> : vector<128x32xf32>
    %2 = tpu.matmul %0, %1, %cst {dimension_numbers = #tpu.dot_dimension_numbers<[1], [0], [0], [1], [0, 0, 1, 1], [], []>} : vector<128x16xbf16>, vector<16x32xbf16>, vector<128x32xf32> -> vector<128x32xf32>
    %c0_3 = arith.constant 0 : index
    %c0_4 = arith.constant 0 : index
    %3 = vector.load %arg3[%c0_3, %c0_4] : memref<1x32xf32, #tpu.memory_space<vmem>>, vector<1x32xf32>
    %4 = vector.broadcast %3 : vector<1x32xf32> to vector<128x32xf32>
    %5 = arith.addf %2, %4 : vector<128x32xf32>
    %cst_5 = arith.constant 0.000000e+00 : f32
    %6 = vector.broadcast %cst_5 : f32 to vector<128x32xf32>
    %7 = arith.maximumf %5, %6 : vector<128x32xf32>
    %c0_6 = arith.constant 0 : index
    %c0_7 = arith.constant 0 : index
    %8 = vector.load %arg4[%c0_6, %c0_7] : memref<1x32xf32, #tpu.memory_space<vmem>>, vector<1x32xf32>
    %9 = vector.broadcast %8 : vector<1x32xf32> to vector<128x32xf32>
    %10 = arith.mulf %7, %9 : vector<128x32xf32>
    %cst_8 = arith.constant dense<0.000000e+00> : vector<128xf32>
    %11 = vector.multi_reduction <add>, %10, %cst_8 [1] : vector<128x32xf32> to vector<128xf32>
    %c0_9 = arith.constant 0 : index
    %12 = memref.load %arg5[%c0_9] : memref<1xf32, #tpu.memory_space<smem>>
    %13 = vector.broadcast %12 : f32 to vector<128xf32>
    %14 = arith.addf %11, %13 : vector<128xf32>
    %cst_10 = arith.constant 0.000000e+00 : f32
    %15 = vector.broadcast %cst_10 : f32 to vector<128xf32>
    %16 = arith.subf %15, %14 : vector<128xf32>
    %17 = math.exp %16 : vector<128xf32>
    %cst_11 = arith.constant 1.000000e+00 : f32
    %18 = vector.broadcast %cst_11 : f32 to vector<128xf32>
    %19 = arith.addf %18, %17 : vector<128xf32>
    %20 = tpu.reciprocal %19 {approx = true} : vector<128xf32> -> vector<128xf32>
    %21 = vector.shape_cast %20 : vector<128xf32> to vector<1x128xf32>
    %c0_12 = arith.constant 0 : index
    %c0_13 = arith.constant 0 : index
    %22 = vector.load %arg6[%c0_12, %c0_13] : memref<1x128xf32, #tpu.memory_space<vmem>>, vector<1x128xf32>
    tpu.vector_store %arg6[%c0_12, %c0_13], %21 {strides = array<i32>} : memref<1x128xf32, #tpu.memory_space<vmem>>, vector<1x128xf32>,
    return
  }
  func.func @transform_0(%arg0: i32) -> (i32, i32) {
    %c0_i32 = arith.constant 0 : i32
    %c0_i32_0 = arith.constant 0 : i32
    return %arg0, %c0_i32 : i32, i32
  }
  func.func @transform_1(%arg0: i32) -> (i32, i32) {
    %c0_i32 = arith.constant 0 : i32
    %c0_i32_0 = arith.constant 0 : i32
    %c0_i32_1 = arith.constant 0 : i32
    return %c0_i32, %c0_i32_0 : i32, i32
  }
  func.func @transform_2(%arg0: i32) -> (i32, i32) {
    %c0_i32 = arith.constant 0 : i32
    %c0_i32_0 = arith.constant 0 : i32
    %c0_i32_1 = arith.constant 0 : i32
    return %c0_i32, %c0_i32_0 : i32, i32
  }
  func.func @transform_3(%arg0: i32) -> (i32, i32) {
    %c0_i32 = arith.constant 0 : i32
    %c0_i32_0 = arith.constant 0 : i32
    %c0_i32_1 = arith.constant 0 : i32
    return %c0_i32, %c0_i32_0 : i32, i32
  }
  func.func @transform_4(%arg0: i32) -> i32 {
    %c0_i32 = arith.constant 0 : i32
    %c0_i32_0 = arith.constant 0 : i32
    return %c0_i32 : i32
  }
  func.func @transform_5(%arg0: i32) -> (i32, i32) {
    %c0_i32 = arith.constant 0 : i32
    %c0_i32_0 = arith.constant 0 : i32
    return %c0_i32, %arg0 : i32, i32
  }
}

</mosaic_0001>

<bundles_post_ra>
// kernel: gan_discriminator.1
= control target key start
LH: loop header
LB: loop body
LE: loop exit
PB: predicated region body
PF: predicated region fallthrough
CT: control target
= control target key end

     0   :  { %vm93_vm0 = vcmask 130048   ;;  %vm254_vm1 = vcmask 261120   ;;  %vm428_vm2 = vcmask 130112   ;;  %vm435_vm3 = vcmask 195712   ;;  %s848_s1 = inlined_call_operand.vmem [shape: bf16[16,32], index: 1, kind: input, shape index: {}]   ;;  %s849_s0 = inlined_call_operand.vmem [shape: bf16[128,16], index: 0, kind: input, shape index: {}]   ;;  %s850_s2 = inlined_call_operand.vmem [shape: f32[1,32], index: 2, kind: input, shape index: {}]   ;;  %s851_s3 = inlined_call_operand.vmem [shape: f32[1,32], index: 3, kind: input, shape index: {}]   ;;  %s852_s4 = inlined_call_operand.<no memory space> [shape: f32[1], index: 4, kind: input, shape index: {}]   ;;  %s853_s5 = inlined_call_operand.vmem [shape: f32[1,128], index: 5, kind: output, shape index: {}]  }
   0x1   :  { %v582_v0 = vld [vmem:[%s848_s1] sm:$0xff]   ;;  %v584_v2 = vld [vmem:[%s849_s0 + $0x8] sm:$0xff]   ;;  %v587_v5 = vld [vmem:[%s849_s0 + $0x10] sm:$0xff]   ;;  %vm442_vm4 = vcmask 261312   ;;  %vm449_vm5 = vcmask 326912   ;;  %vm456_vm6 = vcmask 392512  }
   0x2   :  { %v583_v1 = vld [vmem:[%s849_s0] sm:$0xff]   ;;  %562 = vmatprep.subr.bf16.mxu0 %v582_v0  ;;  %580 = vmatprep.subr.bf16.mxu1 %v582_v0  ;;  %v586_v4 = vld [vmem:[%s849_s0 + $0x28] sm:$0xff]   ;;  %v589_v6 = vld [vmem:[%s849_s0 + $0x30] sm:$0xff]   ;;  %vm463_vm7 = vcmask 458112   ;;  %vm470_vm8 = vcmask 523712   ;;  %vm477_vm9 = vcmask 589312  }
   0x3   :  { %563 = vmatpush3.bf16.msra.mxu0 %v582_v0  ;;  %581 = vmatpush3.bf16.msra.mxu1 %v582_v0  ;;  %v585_v3 = vld [vmem:[%s849_s0 + $0x20] sm:$0xff]   ;;  %v588_v7 = vld [vmem:[%s849_s0 + $0x18] sm:$0xff]   ;;  %vm484_vm10 = vcmask 654912   ;;  %vm491_vm11 = vcmask 720512   ;;  %vm498_vm12 = vcmask 786112   ;;  %vm505_vm13 = vcmask 851712  }
   0x4   :  { %564 = vmatprep.mubr.msk.bf16.mxu0 %vm93_vm0, %v583_v1  ;;  %572 = vmatprep.mubr.msk.bf16.mxu1 %vm93_vm0, %v585_v3  ;;  %v590_v8 = vld [vmem:[%s849_s0 + $0x38] sm:$0xff]   ;;  %v723_v9 = vld [vmem:[%s850_s2] ss:$0 sm:$0xff]  ;;  %vm512_vm14 = vcmask 917312   ;;  %vm519_vm15 = vcmask 982912  }
   0x5   :  { %v731_v19 = vld [vmem:[%s851_s3] ss:$0 sm:$0xff] }
   0x6   :  { %565 = vmatmul.mubr.msk.bf16.vlgmr.msra.gmra.mrb[0].mxu0 %vm93_vm0, %v584_v2  ;;  %573 = vmatmul.mubr.msk.bf16.vlgmr.msra.gmra.mrb[0].mxu1 %vm93_vm0, %v586_v4 }
   0x7   :  { %568 = vmatprep.mubr.msk.bf16.mxu0 %vm93_vm0, %v587_v5  ;;  %576 = vmatprep.mubr.msk.bf16.mxu1 %vm93_vm0, %v589_v6 }
   0xe   :  { %569 = vmatmul.mubr.msk.bf16.gmra.mrb[4].mxu0 %vm93_vm0, %v588_v7  ;;  %577 = vmatmul.mubr.msk.bf16.gmra.mrb[4].mxu1 %vm93_vm0, %v590_v8  ;;  %vm526_vm0 = vcmask 1048512  }
  0xd9   :  { %v566_v10 = vpop.f32.mrb[0].mxu0  ;;  %v574_v11 = vpop.f32.mrb[0].mxu1 }
  0xda   :  { %v161_v12 = vadd.f32 %v566_v10, %v723_v9  ;;  %v152_v13 = vpop.f32.mrb[1].mxu0  ;;  %v184_v14 = vpop.f32.mrb[1].mxu1  ;;  %v193_v60 = vadd.f32 %v574_v11, %v723_v9 }
  0xdb   :  { %v153_v15 = vadd.f32 %v723_v9, %v152_v13  ;;  %v567_v16 = vpop.f32.mrb[2].mxu0  ;;  %v185_v17 = vadd.f32 %v723_v9, %v184_v14  ;;  %v575_v18 = vpop.f32.mrb[2].mxu1 }
  0xdc   :  { %v217_v20 = vmax.f32 %v161_v12, 0.0  ;;  %v164_v21 = vadd.f32 %v567_v16, %v723_v9  ;;  %v155_v22 = vpop.f32.mrb[3].mxu0  ;;  %v187_v23 = vpop.f32.mrb[3].mxu1  ;;  %v196_v56 = vadd.f32 %v575_v18, %v723_v9  ;;  %v225_v4 = vmax.f32 %v193_v60, 0.0 }
  0xdd   :  { %v215_v24 = vmax.f32 %v153_v15, 0.0  ;;  %v223_v25 = vmax.f32 %v185_v17, 0.0  ;;  %v156_v26 = vadd.f32 %v723_v9, %v155_v22  ;;  %v188_v27 = vadd.f32 %v723_v9, %v187_v23 }
  0xde   :  { %v218_v28 = vmax.f32 %v164_v21, 0.0  ;;  %v240_v29 = vmul.f32 %v731_v19, %v217_v20  ;;  %v226_v2 = vmax.f32 %v196_v56, 0.0  ;;  %v248_v15 = vmul.f32 %v731_v19, %v225_v4 }
  0xdf   :  { %v238_v30 = vmul.f32 %v731_v19, %v215_v24  ;;  %v246_v31 = vmul.f32 %v731_v19, %v223_v25  ;;  %v224_v32 = vmax.f32 %v188_v27, 0.0  ;;  %v216_v35 = vmax.f32 %v156_v26, 0.0 }
  0xe0   :  { %v261_v33 = vsel %vm254_vm1, %v240_v29, 0.0  ;;  %v241_v34 = vmul.f32 %v731_v19, %v218_v28  ;;  %v249_v11 = vmul.f32 %v731_v19, %v226_v2  ;;  %v285_v21 = vsel %vm254_vm1, %v248_v15, 0.0 }
  0xe1   :  { %262 = vadd.xlane.f32.xlu1 %v261_v33  ;;  %v570_v36 = vpop.f32.mrb[4].mxu0  ;;  %v255_v37 = vsel %vm254_vm1, %v238_v30, 0.0  ;;  %v578_v38 = vpop.f32.mrb[4].mxu1  ;;  %v279_v43 = vsel %vm254_vm1, %v246_v31, 0.0  ;;  %v247_v49 = vmul.f32 %v731_v19, %v224_v32  ;;  %v239_v53 = vmul.f32 %v731_v19, %v216_v35 }
  0xe2   :  { %v177_v39 = vadd.f32 %v570_v36, %v723_v9  ;;  %256 = vadd.xlane.f32.xlu0 %v255_v37  ;;  %v168_v40 = vpop.f32.mrb[5].mxu0  ;;  %v200_v41 = vpop.f32.mrb[5].mxu1  ;;  %v264_v47 = vsel %vm254_vm1, %v241_v34, 0.0  ;;  %v209_v12 = vadd.f32 %v578_v38, %v723_v9  ;;  %v288_v18 = vsel %vm254_vm1, %v249_v11, 0.0 }
  0xe3   :  { %v571_v42 = vpop.f32.mrb[6].mxu0  ;;  %v579_v44 = vpop.f32.mrb[6].mxu1  ;;  %v169_v51 = vadd.f32 %v723_v9, %v168_v40  ;;  %v282_v58 = vsel %vm254_vm1, %v247_v49, 0.0  ;;  %v258_v62 = vsel %vm254_vm1, %v239_v53, 0.0  ;;  %v201_v5 = vadd.f32 %v723_v9, %v200_v41 }
  0xe4   :  { %v221_v45 = vmax.f32 %v177_v39, 0.0  ;;  %v180_v46 = vadd.f32 %v571_v42, %v723_v9  ;;  %v171_v48 = vpop.f32.mrb[7].mxu0  ;;  %v203_v50 = vpop.f32.mrb[7].mxu1  ;;  %v212_v8 = vadd.f32 %v579_v44, %v723_v9  ;;  %v229_v20 = vmax.f32 %v209_v12, 0.0 }
  0xe5   :  { %265 = vadd.xlane.f32.xlu1 %v264_v47  ;;  %v172_v52 = vadd.f32 %v723_v9, %v171_v48  ;;  %v219_v61 = vmax.f32 %v169_v51, 0.0  ;;  %v204_v0 = vadd.f32 %v723_v9, %v203_v50  ;;  %v227_v13 = vmax.f32 %v201_v5, 0.0 }
  0xe6   :  { %v222_v54 = vmax.f32 %v180_v46, 0.0  ;;  %280 = vadd.xlane.f32.xlu0 %v279_v43  ;;  %v244_v55 = vmul.f32 %v731_v19, %v221_v45  ;;  %v230_v17 = vmax.f32 %v212_v8, 0.0  ;;  %v252_v25 = vmul.f32 %v731_v19, %v229_v20 }
  0xe7   :  { %v220_v57 = vmax.f32 %v172_v52, 0.0  ;;  %v242_v6 = vmul.f32 %v731_v19, %v219_v61  ;;  %v228_v7 = vmax.f32 %v204_v0, 0.0  ;;  %v250_v22 = vmul.f32 %v731_v19, %v227_v13 }
  0xe8   :  { %v245_v59 = vmul.f32 %v731_v19, %v222_v54  ;;  %v273_v1 = vsel %vm254_vm1, %v244_v55, 0.0  ;;  %v253_v23 = vmul.f32 %v731_v19, %v230_v17  ;;  %v297_v27 = vsel %vm254_vm1, %v252_v25, 0.0 }
  0xe9   :  { %283 = vadd.xlane.f32.xlu1 %v282_v58  ;;  %v243_v3 = vmul.f32 %v731_v19, %v220_v57  ;;  %v267_v14 = vsel %vm254_vm1, %v242_v6, 0.0  ;;  %v251_v16 = vmul.f32 %v731_v19, %v228_v7  ;;  %v291_v24 = vsel %vm254_vm1, %v250_v22, 0.0 }
  0xea   :  { %259 = vadd.xlane.f32.xlu0 %v258_v62  ;;  %v276_v63 = vsel %vm254_vm1, %v245_v59, 0.0  ;;  %v300_v26 = vsel %vm254_vm1, %v253_v23, 0.0  ;;  %v781_v28 = vstv %s852_s4 }
  0xeb   :  { %v270_v10 = vsel %vm254_vm1, %v243_v3, 0.0  ;;  %v294_v9 = vsel %vm254_vm1, %v251_v16, 0.0 }
  0xed   :  { %277 = vadd.xlane.f32.xlu1 %v276_v63 }
  0xee   :  { %274 = vadd.xlane.f32.xlu0 %v273_v1 }
  0xf1   :  { %271 = vadd.xlane.f32.xlu1 %v270_v10 }
  0xf2   :  { %268 = vadd.xlane.f32.xlu0 %v267_v14 }
  0xf5   :  { %289 = vadd.xlane.f32.xlu1 %v288_v18 }
  0xf6   :  { %286 = vadd.xlane.f32.xlu0 %v285_v21 }
  0xf9   :  { %295 = vadd.xlane.f32.xlu1 %v294_v9  ;;  %v417_v9 = vlaneseq }
  0xfa   :  { %292 = vadd.xlane.f32.xlu0 %v291_v24 }
  0xfd   :  { %301 = vadd.xlane.f32.xlu1 %v300_v26 }
  0xfe   :  { %298 = vadd.xlane.f32.xlu0 %v297_v27 }
 0x16e   :  { %v263_v29 = vpop.xlane.xlu1 %262 }
 0x16f   :  { %v257_v30 = vpop.xlane.xlu0 %256  ;;  %v307_v32 = vadd.f32 %v781_v28, %v263_v29 }
 0x170   :  { %v305_v31 = vadd.f32 %v781_v28, %v257_v30 }
 0x171   :  { %v323_v36 = vsub.f32 0.0, %v307_v32 }
 0x172   :  { %v321_v33 = vsub.f32 0.0, %v305_v31  ;;  %v266_v19 = vpop.xlane.xlu1 %265 }
 0x173   :  { %v308_v34 = vadd.f32 %v781_v28, %v266_v19  ;;  %v281_v35 = vpop.xlane.xlu0 %280  ;;  %v341_v42 = vmul.f32 1.442695, %v323_v36 }
 0x174   :  { %v337_v37 = vmul.f32 1.442695, %v321_v33  ;;  %v313_v43 = vadd.f32 %v781_v28, %v281_v35  ;;  %v799_v35 = vand.u32 127, %v417_v9 }
 0x175   :  { %v324_v39 = vsub.f32 0.0, %v308_v34 }
 0x176   :  { %v284_v38 = vpop.xlane.xlu1 %283  ;;  %591 = vpow2.f32 %v337_v37  ;;  %v329_v53 = vsub.f32 0.0, %v313_v43 }
 0x177   :  { %v260_v40 = vpop.xlane.xlu0 %259  ;;  %v343_v46 = vmul.f32 1.442695, %v324_v39  ;;  %v314_v47 = vadd.f32 %v781_v28, %v284_v38  ;;  %593 = vpow2.f32 %v341_v42 }
 0x178   :  { %v306_v41 = vadd.f32 %v781_v28, %v260_v40  ;;  %v353_v63 = vmul.f32 1.442695, %v329_v53  ;;  %v423_v40 = vadd.s32 4294967288, %v799_v35 }
 0x179   :  { %v330_v56 = vsub.f32 0.0, %v314_v47  ;;  %v430_v47 = vadd.s32 4294967280, %v799_v35 }
 0x17a   :  { %v322_v44 = vsub.f32 0.0, %v306_v41  ;;  %v278_v45 = vpop.xlane.xlu1 %277 }
 0x17b   :  { %v312_v48 = vadd.f32 %v781_v28, %v278_v45  ;;  %v275_v49 = vpop.xlane.xlu0 %274  ;;  %v355_v3 = vmul.f32 1.442695, %v330_v56 }
 0x17c   :  { %v339_v50 = vmul.f32 1.442695, %v322_v44  ;;  %v311_v51 = vadd.f32 %v781_v28, %v275_v49 }
 0x17d   :  { %v328_v52 = vsub.f32 0.0, %v312_v48 }
 0x17e   :  { %595 = vpow2.f32 %v339_v50  ;;  %v327_v54 = vsub.f32 0.0, %v311_v51  ;;  %v272_v55 = vpop.xlane.xlu1 %271 }
 0x17f   :  { %597 = vpow2.f32 %v343_v46  ;;  %v351_v57 = vmul.f32 1.442695, %v328_v52  ;;  %v310_v58 = vadd.f32 %v781_v28, %v272_v55  ;;  %v269_v59 = vpop.xlane.xlu0 %268  ;;  %v437_v55 = vadd.s32 4294967272, %v799_v35 }
 0x180   :  { %v349_v60 = vmul.f32 1.442695, %v327_v54  ;;  %v309_v61 = vadd.f32 %v781_v28, %v269_v59  ;;  %v592_v2 = vpop.eup %591 }
 0x181   :  { %v326_v62 = vsub.f32 0.0, %v310_v58  ;;  %599 = vpow2.f32 %v351_v57  ;;  %v369_v11 = vadd.f32 1.0, %v592_v2  ;;  %v594_v14 = vpop.eup %593  ;;  %v465_v2 = vadd.s32 4294967240, %v799_v35 }
 0x182   :  { %v325_v0 = vsub.f32 0.0, %v309_v61  ;;  %v290_v1 = vpop.xlane.xlu1 %289  ;;  %601 = vpow2.f32 %v349_v60  ;;  %v371_v25 = vadd.f32 1.0, %v594_v14  ;;  %v811_v61 = vadd.s32 4294967232, %v799_v35 }
 0x183   :  { %v347_v4 = vmul.f32 1.442695, %v326_v62  ;;  %v316_v5 = vadd.f32 %v781_v28, %v290_v1  ;;  %v287_v6 = vpop.xlane.xlu0 %286  ;;  %v814_v62 = vadd.s32 4294967224, %v799_v35 }
 0x184   :  { %v345_v7 = vmul.f32 1.442695, %v325_v0  ;;  %v315_v8 = vadd.f32 %v781_v28, %v287_v6  ;;  %v444_v6 = vadd.s32 4294967264, %v799_v35 }
 0x185   :  { %603 = vpow2.f32 %v347_v4  ;;  %v332_v10 = vsub.f32 0.0, %v316_v5 }
 0x186   :  { %605 = vpow2.f32 %v353_v63  ;;  %v331_v12 = vsub.f32 0.0, %v315_v8  ;;  %v296_v13 = vpop.xlane.xlu1 %295 }
 0x187   :  { %607 = vpow2.f32 %v355_v3  ;;  %v359_v15 = vmul.f32 1.442695, %v332_v10  ;;  %v318_v16 = vadd.f32 %v781_v28, %v296_v13  ;;  %v293_v17 = vpop.xlane.xlu0 %292  ;;  %v458_v10 = vadd.s32 4294967248, %v799_v35 }
 0x188   :  { %v596_v18 = vpop.eup %595  ;;  %609 = vpow2.f32 %v345_v7  ;;  %v357_v20 = vmul.f32 1.442695, %v331_v12  ;;  %v317_v21 = vadd.f32 %v781_v28, %v293_v17 }
 0x189   :  { %v598_v22 = vpop.eup %597  ;;  %v370_v23 = vadd.f32 1.0, %v596_v18  ;;  %611 = vpow2.f32 %v359_v15  ;;  %v334_v24 = vsub.f32 0.0, %v318_v16 }
 0x18a   :  { %613 = vrcp.f32 %v369_v11  ;;  %v333_v26 = vsub.f32 0.0, %v317_v21  ;;  %v302_v27 = vpop.xlane.xlu1 %301  ;;  %v372_v32 = vadd.f32 1.0, %v598_v22  ;;  %v451_v11 = vadd.s32 4294967256, %v799_v35 }
 0x18b   :  { %615 = vrcp.f32 %v370_v23  ;;  %v363_v29 = vmul.f32 1.442695, %v334_v24  ;;  %v320_v30 = vadd.f32 %v781_v28, %v302_v27  ;;  %v299_v31 = vpop.xlane.xlu0 %298  ;;  %v600_v34 = vpop.eup %599  ;;  %v493_v23 = vadd.s32 4294967208, %v799_v35 }
 0x18c   :  { %617 = vpow2.f32 %v357_v20  ;;  %v361_v33 = vmul.f32 1.442695, %v333_v26  ;;  %v319_v19 = vadd.f32 %v781_v28, %v299_v31  ;;  %v602_v37 = vpop.eup %601  ;;  %v802_v28 = vshrl.u32 %v417_v9, 7 }
 0x18d   :  { %619 = vpow2.f32 %v363_v29  ;;  %v336_v36 = vsub.f32 0.0, %v320_v30  ;;  %v375_v41 = vadd.f32 1.0, %v602_v37  ;;  %v376_v49 = vadd.f32 1.0, %v600_v34 }
 0x18e   :  { %621 = vrcp.f32 %v371_v25  ;;  %v335_v38 = vsub.f32 0.0, %v319_v19  ;;  %v426_v52 = vsub.s32 %v423_v40, %v802_v28  ;;  %v433_v58 = vsub.s32 %v430_v47, %v802_v28 }
 0x18f   :  { %v604_v39 = vpop.eup %603  ;;  %623 = vpow2.f32 %v361_v33  ;;  %v367_v42 = vmul.f32 1.442695, %v336_v36  ;;  %v421_v59 = vsub.s32 %v799_v35, %v802_v28  ;;  %v440_v5 = vsub.s32 %v437_v55, %v802_v28 }
 0x190   :  { %v606_v43 = vpop.eup %605  ;;  %625 = vrcp.f32 %v372_v32  ;;  %v374_v44 = vadd.f32 1.0, %v604_v39  ;;  %v365_v45 = vmul.f32 1.442695, %v335_v38  ;;  %v475_v13 = vsub.s32 %v811_v61, %v802_v28 }
 0x191   :  { %v608_v46 = vpop.eup %607  ;;  %627 = vrcp.f32 %v375_v41  ;;  %v377_v51 = vadd.f32 1.0, %v606_v43  ;;  %v482_v17 = vsub.s32 %v814_v62, %v802_v28  ;;  %v468_v20 = vsub.s32 %v465_v2, %v802_v28 }
 0x192   :  { %v610_v48 = vpop.eup %609  ;;  %629 = vrcp.f32 %v374_v44  ;;  %v378_v56 = vadd.f32 1.0, %v608_v46  ;;  %v447_v9 = vsub.s32 %v444_v6, %v802_v28  ;;  %v461_v25 = vsub.s32 %v458_v10, %v802_v28 }
 0x193   :  { %v612_v50 = vpop.eup %611  ;;  %v373_v53 = vadd.f32 1.0, %v610_v48  ;;  %631 = vpow2.f32 %v367_v42  ;;  %v454_v26 = vsub.s32 %v451_v11, %v802_v28  ;;  %v486_v27 = vadd.s32 4294967216, %v799_v35 }
 0x194   :  { %v614_v54 = vpop.eup %613  ;;  %633 = vpow2.f32 %v365_v45  ;;  %v380_v63 = vadd.f32 1.0, %v612_v50  ;;  %v500_v19 = vadd.s32 4294967200, %v799_v35  ;;  %v496_v38 = vsub.s32 %v493_v23, %v802_v28 }
 0x195   :  { %v616_v57 = vpop.eup %615  ;;  %635 = vrcp.f32 %v373_v53  ;;  %v422_v8 = vrot.slane %v614_v54, %v421_v59  ;;  %v489_v42 = vsub.s32 %v486_v27, %v802_v28  ;;  %v507_v46 = vadd.s32 4294967192, %v799_v35 }
 0x196   :  { %v618_v60 = vpop.eup %617  ;;  %637 = vrcp.f32 %v376_v49  ;;  %v427_v1 = vrot.slane %v616_v57, %v426_v52  ;;  %v503_v50 = vsub.s32 %v500_v19, %v802_v28  ;;  %v514_v54 = vadd.s32 4294967184, %v799_v35 }
 0x197   :  { %v620_v0 = vpop.eup %619  ;;  %639 = vrcp.f32 %v377_v51  ;;  %v379_v3 = vadd.f32 1.0, %v618_v60  ;;  %v521_v57 = vadd.s32 4294967176, %v799_v35  ;;  %v510_v61 = vsub.s32 %v507_v46, %v802_v28 }
 0x198   :  { %v622_v4 = vpop.eup %621  ;;  %641 = vrcp.f32 %v378_v56  ;;  %v382_v14 = vadd.f32 1.0, %v620_v0  ;;  %v429_v18 = vsel %vm428_vm2, %v427_v1, %v422_v8 }
 0x199   :  { %v624_v7 = vpop.eup %623  ;;  %643 = vrcp.f32 %v379_v3  ;;  %v434_v22 = vrot.slane %v622_v4, %v433_v58  ;;  %v517_v3 = vsub.s32 %v514_v54, %v802_v28 }
 0x19a   :  { %v626_v12 = vpop.eup %625  ;;  %645 = vrcp.f32 %v380_v63  ;;  %v381_v15 = vadd.f32 1.0, %v624_v7 }
 0x19b   :  { %v628_v16 = vpop.eup %627  ;;  %v436_v30 = vsel %vm435_vm3, %v434_v22, %v429_v18  ;;  %v441_v33 = vrot.slane %v626_v12, %v440_v5  ;;  %v524_v5 = vsub.s32 %v521_v57, %v802_v28 }
 0x19c   :  { %v630_v21 = vpop.eup %629  ;;  %647 = vrcp.f32 %v381_v15  ;;  %v462_v44 = vrot.slane %v628_v16, %v461_v25 }
 0x19d   :  { %v632_v24 = vpop.eup %631  ;;  %649 = vrcp.f32 %v382_v14  ;;  %v455_v40 = vrot.slane %v630_v21, %v454_v26  ;;  %v443_v41 = vsel %vm442_vm4, %v441_v33, %v436_v30 }
 0x19e   :  { %v634_v29 = vpop.eup %633  ;;  %v384_v31 = vadd.f32 1.0, %v632_v24 }
 0x19f   :  { %v636_v32 = vpop.eup %635  ;;  %v383_v34 = vadd.f32 1.0, %v634_v29 }
 0x1a0   :  { %v638_v36 = vpop.eup %637  ;;  %v448_v37 = vrot.slane %v636_v32, %v447_v9  ;;  %651 = vrcp.f32 %v384_v31 }
 0x1a1   :  { %v640_v39 = vpop.eup %639  ;;  %653 = vrcp.f32 %v383_v34  ;;  %v469_v48 = vrot.slane %v638_v36, %v468_v20 }
 0x1a2   :  { %v642_v43 = vpop.eup %641  ;;  %v450_v45 = vsel %vm449_vm5, %v448_v37, %v443_v41  ;;  %v476_v52 = vrot.slane %v640_v39, %v475_v13 }
 0x1a3   :  { %v644_v47 = vpop.eup %643  ;;  %v457_v49 = vsel %vm456_vm6, %v455_v40, %v450_v45  ;;  %v483_v55 = vrot.slane %v642_v43, %v482_v17 }
 0x1a4   :  { %v646_v51 = vpop.eup %645  ;;  %v464_v53 = vsel %vm463_vm7, %v462_v44, %v457_v49  ;;  %v490_v60 = vrot.slane %v644_v47, %v489_v42 }
 0x1a5   :  { %v471_v56 = vsel %vm470_vm8, %v469_v48, %v464_v53  ;;  %v497_v62 = vrot.slane %v646_v51, %v496_v38 }
 0x1a6   :  { %v648_v58 = vpop.eup %647  ;;  %v478_v59 = vsel %vm477_vm9, %v476_v52, %v471_v56 }
 0x1a7   :  { %v485_v63 = vsel %vm484_vm10, %v483_v55, %v478_v59  ;;  %v504_v0 = vrot.slane %v648_v58, %v503_v50  ;;  %v650_v1 = vpop.eup %649 }
 0x1a8   :  { %v492_v2 = vsel %vm491_vm11, %v490_v60, %v485_v63  ;;  %v511_v8 = vrot.slane %v650_v1, %v510_v61 }
 0x1a9   :  { %v499_v4 = vsel %vm498_vm12, %v497_v62, %v492_v2 }
 0x1aa   :  { %v652_v6 = vpop.eup %651  ;;  %v506_v7 = vsel %vm505_vm13, %v504_v0, %v499_v4 }
 0x1ab   :  { %v654_v35 = vpop.eup %653  ;;  %v525_v11 = vrot.slane %v652_v6, %v524_v5  ;;  %v513_v12 = vsel %vm512_vm14, %v511_v8, %v506_v7 }
 0x1ac   :  { %v518_v10 = vrot.slane %v654_v35, %v517_v3 }
 0x1ae   :  { %v520_v13 = vsel %vm519_vm15, %v518_v10, %v513_v12 }
 0x1af   :  { %v527_v14 = vsel %vm526_vm0, %v525_v11, %v520_v13 }
 0x1b0   :  { %529 = vst [vmem:[%s853_s5] sm:$0x1] %v527_v14 }

</bundles_post_ra>
